<compile_context>
chip_gen: v7x
topology: tpu7x:2x2x1
jax: 0.10.0
libtpu: 0.0.40
codegen_flags: <defaults>
</compile_context>

<pallas_src>
import math

import jax
import jax.numpy as jnp
import numpy as np
from jax.experimental import pallas as pl
from jax.experimental.pallas import tpu as pltpu

_PI2 = 2.0 * math.pi
_PI2_HI = np.float32(_PI2)                         # f32(2*pi)
_PI2_LO = np.float32(_PI2 - float(_PI2_HI))        # residual (Cody-Waite)
_INV_PI2 = np.float32(1.0 / _PI2)


def _sin_reduced(x):
    """sin(x) with explicit two-constant (Cody-Waite) 2*pi range reduction.

    Mathematically identical (sin is 2*pi periodic); keeps f32 accuracy for
    large diffusion timesteps regardless of the backend transcendental path.
    The extra VALU ops are free filler in this memory-bound kernel.
    """
    n = jnp.floor(x * _INV_PI2 + 0.5)
    r = (x - n * _PI2_HI) - n * _PI2_LO
    return jnp.sin(r)


def _emb_kernel(time_ref, table_ref, out_ref):
    # time_ref:  (TB, 1)   f32  timesteps on sublanes
    # table_ref: (2, dim)  f32  row0 = [freqs|freqs], row1 = [0|pi/2]
    # out_ref:   (TB, dim)
    tbl = table_ref[...]
    args = time_ref[...] * tbl[0:1, :] + tbl[1:2, :]          # free VPU broadcast
    out_ref[...] = _sin_reduced(args).astype(out_ref.dtype)   # single full-width store


def _emb_kernel_folded(time_ref, onehot_ref, table_ref, out_ref):
    # Lane-folded fast path for dim < 128 (R = 128 // dim batch rows per lane row).
    # time_ref:   (TR, R)    f32
    # onehot_ref: (R, 128)   f32  onehot[r, l] = (l // dim == r)
    # table_ref:  (2, 128)   f32  tiled [freqs|freqs] / [0|pi/2]
    # out_ref:    (TR, 128)        lane-dense view of R batch rows per row
    t = jnp.dot(time_ref[...], onehot_ref[...],
                preferred_element_type=jnp.float32)            # idle MXU does the expand
    tbl = table_ref[...]
    args = t * tbl[0:1, :] + tbl[1:2, :]
    out_ref[...] = _sin_reduced(args).astype(out_ref.dtype)


def _host_tables(dim):
    half = dim // 2
    scale = math.log(10000.0) / (half - 1)
    freqs = np.exp(-scale * np.arange(half, dtype=np.float64)).astype(np.float32)
    freqs_full = np.concatenate([freqs, freqs])                               # (dim,)
    phase = np.concatenate([np.zeros(half, np.float32),
                            np.full(half, math.pi / 2.0, dtype=np.float32)])  # (dim,)
    return freqs_full, phase


def _pick_tile_rows(rows, row_bytes, *, target_bytes=2 << 20):
    """Rows per grid step: ~target_bytes of output per tile; >=2 grid steps for
    large inputs (v7x megacore); multiple of 8 sublanes unless it covers all rows."""
    if rows <= 8 or rows * row_bytes <= (1 << 20):
        return rows                           # small problem: one block, no grid overhead
    tr = max(8, target_bytes // row_bytes)
    tr = min(tr, -(-rows // 2))               # >= 2 steps so both v7x TCs get work
    tr = min(tr, rows)
    if tr >= rows:
        return rows
    return max(8, (tr // 8) * 8)


def _clamp_block_rows(block_rows, rows):
    tr = min(block_rows, rows)
    if tr < rows:
        tr = max(8, (tr // 8) * 8)
    return tr


def sinusoidal_position_embeddings(time, dim, *, out_dtype=jnp.float32, block_rows=None):
    """time: (B,) float timesteps -> (B, dim) embeddings (matches the torch module)."""
    assert dim % 2 == 0 and dim >= 4, "dim must be even and >= 4 (half_dim - 1 > 0)"
    b = int(time.shape[0])
    freqs_full, phase = _host_tables(dim)
    time_f32 = time.astype(jnp.float32)
    row_bytes_factor = jnp.dtype(out_dtype).itemsize
    cparams = pltpu.CompilerParams(dimension_semantics=("parallel",))

    use_fold = (dim < 128) and (128 % dim == 0) and ((b * dim) % 128 == 0)

    if use_fold:
        lanes = 128
        r_fold = lanes // dim                 # batch rows folded per 128-lane output row
        rows = (b * dim) // lanes             # = b // r_fold
        table = jnp.asarray(np.stack([np.tile(freqs_full, r_fold),
                                      np.tile(phase, r_fold)]), dtype=jnp.float32)
        onehot = jnp.asarray(
            (np.arange(lanes)[None, :] // dim == np.arange(r_fold)[:, None]
             ).astype(np.float32))
        time2 = time_f32.reshape(rows, r_fold)
        tr = (_pick_tile_rows(rows, lanes * row_bytes_factor) if block_rows is None
              else _clamp_block_rows(block_rows, rows))
        out = pl.pallas_call(
            _emb_kernel_folded,
            out_shape=jax.ShapeDtypeStruct((rows, lanes), out_dtype),
            grid=(pl.cdiv(rows, tr),),
            in_specs=[
                pl.BlockSpec((tr, r_fold), lambda i: (i, 0)),
                pl.BlockSpec((r_fold, lanes), lambda i: (0, 0)),
                pl.BlockSpec((2, lanes), lambda i: (0, 0)),
            ],
            out_specs=pl.BlockSpec((tr, lanes), lambda i: (i, 0)),
            compiler_params=cparams,
        )(time2, onehot, table)
        # `out` is the row-major (b, dim) buffer viewed lane-dense; a fused consumer
        # should take it as-is.  Standalone, reshape back to the module's shape.
        return out.reshape(b, dim)

    # General path (dim >= 128, or dim does not divide 128).
    table = jnp.asarray(np.stack([freqs_full, phase]), dtype=jnp.float32)   # (2, dim)
    time2 = time_f32.reshape(b, 1)
    tb = (_pick_tile_rows(b, dim * row_bytes_factor) if block_rows is None
          else _clamp_block_rows(block_rows, b))
    out = pl.pallas_call(
        _emb_kernel,
        out_shape=jax.ShapeDtypeStruct((b, dim), out_dtype),
        grid=(pl.cdiv(b, tb),),   # ragged last block is masked by Pallas (no pad/slice)
        in_specs=[
            pl.BlockSpec((tb, 1), lambda i: (i, 0)),
            pl.BlockSpec((2, dim), lambda i: (0, 0)),
        ],
        out_specs=pl.BlockSpec((tb, dim), lambda i: (i, 0)),
        compiler_params=cparams,
    )(time2, table)
    return out


def _reference(time, dim):
    half_dim = dim // 2
    scale = math.log(10000.0) / (half_dim - 1)
    freqs = jnp.exp(jnp.arange(half_dim, dtype=jnp.float32) * -scale)
    emb = time.astype(jnp.float32)[:, None] * freqs[None, :]
    return jnp.concatenate([jnp.sin(emb), jnp.cos(emb)], axis=-1)


if __name__ == "__main__":
    key = jax.random.PRNGKey(0)
    batch = 8
    dim = 32  # embedding dimension (the module's __init__ arg)

    # deterministic example timesteps, like diffusion step indices in [0, 1000)
    time = jax.random.randint(key, (batch,), 0, 1000).astype(jnp.float32)

    # 1) lane-folded fast path (dim=32 < 128)
    out = jax.block_until_ready(sinusoidal_position_embeddings(time, dim))
    ref = _reference(time, dim)
    assert out.shape == (batch, dim) and out.dtype == jnp.float32
    # Values live in [-1, 1]; 2e-3 absolute tolerance absorbs backend
    # transcendental differences at timestep ~1e3.
    assert jnp.allclose(out, ref, atol=2e-3, rtol=0.0), "fast-path mismatch vs reference"

    # 2) general path with a ragged batch tile (dim=128, b=10, tile=8 -> masked last block)
    t2 = jax.random.uniform(jax.random.PRNGKey(1), (10,), minval=0.0, maxval=1000.0)
    out2 = jax.block_until_ready(
        sinusoidal_position_embeddings(t2, 128, block_rows=8))
    assert jnp.allclose(out2, _reference(t2, 128), atol=2e-3, rtol=0.0), \
        "general-path mismatch vs reference"

    # 3) bf16 store (halves HBM writeback; math stays f32)
    out_bf16 = jax.block_until_ready(
        sinusoidal_position_embeddings(time, dim, out_dtype=jnp.bfloat16))
    assert out_bf16.dtype == jnp.bfloat16
    assert jnp.allclose(out_bf16.astype(jnp.float32), ref, atol=1e-2, rtol=0.0), \
        "bf16 mismatch vs reference"

    # TODO(synk): in the real diffusion model, fuse this into the time-MLP kernel;
    # standalone it is pure launch/DMA overhead at these sizes.
    print("KERNEL_OK")
</pallas_src>

<mosaic_0001>
module attributes {stable_mosaic.version = 11 : i64} {
  func.func @_emb_kernel_folded(%arg0: i32, %arg1: memref<2x4xf32, #tpu.memory_space<vmem>>, %arg2: memref<4x128xf32, #tpu.memory_space<vmem>>, %arg3: memref<2x128xf32, #tpu.memory_space<vmem>>, %arg4: memref<2x128xf32, #tpu.memory_space<vmem>>) attributes {dimension_semantics = [#tpu.dimension_semantics<parallel>], iteration_bounds = array<i64: 1>, scalar_prefetch = 0 : i64, scratch_operands = 0 : i64, tpu.core_type = #tpu.core_type<tc>, window_params = [{transform_indices = @transform_0, window_bounds = array<i64: 2, 4>}, {pipeline_mode = #tpu.pipeline_mode<synchronous>, transform_indices = @transform_1, window_bounds = array<i64: 4, 128>}, {pipeline_mode = #tpu.pipeline_mode<synchronous>, transform_indices = @transform_2, window_bounds = array<i64: 2, 128>}, {transform_indices = @transform_3, window_bounds = array<i64: 2, 128>}]} {
    %c0 = arith.constant 0 : index
    %c0_0 = arith.constant 0 : index
    %0 = vector.load %arg1[%c0, %c0_0] : memref<2x4xf32, #tpu.memory_space<vmem>>, vector<2x4xf32>
    %c0_1 = arith.constant 0 : index
    %c0_2 = arith.constant 0 : index
    %1 = vector.load %arg2[%c0_1, %c0_2] : memref<4x128xf32, #tpu.memory_space<vmem>>, vector<4x128xf32>
    %cst = arith.constant dense<0.000000e+00> : vector<2x128xf32>
    %2 = tpu.matmul %0, %1, %cst {dimension_numbers = #tpu.dot_dimension_numbers<[1], [0], [0], [1], [0, 0, 1, 1], [], []>} : vector<2x4xf32>, vector<4x128xf32>, vector<2x128xf32> -> vector<2x128xf32>
    %c0_3 = arith.constant 0 : index
    %c0_4 = arith.constant 0 : index
    %3 = vector.load %arg3[%c0_3, %c0_4] : memref<2x128xf32, #tpu.memory_space<vmem>>, vector<2x128xf32>
    %4 = vector.extract_strided_slice %3 {offsets = [0, 0], sizes = [1, 128], strides = [1, 1]} : vector<2x128xf32> to vector<1x128xf32>
    %5 = vector.broadcast %4 : vector<1x128xf32> to vector<2x128xf32>
    %6 = arith.mulf %2, %5 : vector<2x128xf32>
    %7 = vector.extract_strided_slice %3 {offsets = [1, 0], sizes = [1, 128], strides = [1, 1]} : vector<2x128xf32> to vector<1x128xf32>
    %8 = vector.broadcast %7 : vector<1x128xf32> to vector<2x128xf32>
    %9 = arith.addf %6, %8 : vector<2x128xf32>
    %cst_5 = arith.constant 0.159154937 : f32
    %10 = vector.broadcast %cst_5 : f32 to vector<2x128xf32>
    %11 = arith.mulf %9, %10 : vector<2x128xf32>
    %cst_6 = arith.constant 5.000000e-01 : f32
    %12 = vector.broadcast %cst_6 : f32 to vector<2x128xf32>
    %13 = arith.addf %11, %12 : vector<2x128xf32>
    %14 = math.floor %13 : vector<2x128xf32>
    %cst_7 = arith.constant 6.28318548 : f32
    %15 = vector.broadcast %cst_7 : f32 to vector<2x128xf32>
    %16 = arith.mulf %14, %15 : vector<2x128xf32>
    %17 = arith.subf %9, %16 : vector<2x128xf32>
    %cst_8 = arith.constant -1.74845553E-7 : f32
    %18 = vector.broadcast %cst_8 : f32 to vector<2x128xf32>
    %19 = arith.mulf %14, %18 : vector<2x128xf32>
    %20 = arith.subf %17, %19 : vector<2x128xf32>
    %21 = math.sin %20 : vector<2x128xf32>
    %c0_9 = arith.constant 0 : index
    %c0_10 = arith.constant 0 : index
    %22 = vector.load %arg4[%c0_9, %c0_10] : memref<2x128xf32, #tpu.memory_space<vmem>>, vector<2x128xf32>
    tpu.vector_store %arg4[%c0_9, %c0_10], %21 {strides = array<i32>} : memref<2x128xf32, #tpu.memory_space<vmem>>, vector<2x128xf32>,
    return
  }
  func.func @transform_0(%arg0: i32) -> (i32, i32) {
    %c0_i32 = arith.constant 0 : i32
    %c0_i32_0 = arith.constant 0 : i32
    return %arg0, %c0_i32 : i32, i32
  }
  func.func @transform_1(%arg0: i32) -> (i32, i32) {
    %c0_i32 = arith.constant 0 : i32
    %c0_i32_0 = arith.constant 0 : i32
    %c0_i32_1 = arith.constant 0 : i32
    return %c0_i32, %c0_i32_0 : i32, i32
  }
  func.func @transform_2(%arg0: i32) -> (i32, i32) {
    %c0_i32 = arith.constant 0 : i32
    %c0_i32_0 = arith.constant 0 : i32
    %c0_i32_1 = arith.constant 0 : i32
    return %c0_i32, %c0_i32_0 : i32, i32
  }
  func.func @transform_3(%arg0: i32) -> (i32, i32) {
    %c0_i32 = arith.constant 0 : i32
    %c0_i32_0 = arith.constant 0 : i32
    return %arg0, %c0_i32 : i32, i32
  }
}

</mosaic_0001>

<bundles_post_ra>
// kernel: tpu_custom_call.1
= control target key start
LH: loop header
LB: loop body
LE: loop exit
PB: predicated region body
PF: predicated region fallthrough
CT: control target
= control target key end

     0   :  { %8 = vsyncpa [#allocation3], 0  ;;  %s453_s0 = inlined_call_operand.hbm [shape: f32[2,4], index: 0, kind: input, shape index: {}]   ;;  %s454_s1 = inlined_call_operand.hbm [shape: f32[4,128], index: 1, kind: input, shape index: {}]   ;;  %s455_s2 = inlined_call_operand.vmem [shape: f32[2,128], index: 2, kind: input, shape index: {}]   ;;  %s456_s3 = inlined_call_operand.hbm [shape: f32[2,128], index: 3, kind: output, shape index: {}]  }
   0x1   :  { %9 = vsyncpa [#allocation6], 0 }
   0x2   :  { %10 = vsyncpa [#allocation4], 0  ;;  %s362_s12 = smov [#allocation2]   ;;  %s363_s14 = smov [#allocation5]  }
   0x3   :  { %s17_s13 = sshll.u32 %s362_s12, 4  ;;  %s27_s15 = sshll.u32 %s363_s14, 4  ;;  %s18_s13 = int_to_ptr.vmem [resolvable:$true] %s17_s13  ;;  %s28_s15 = int_to_ptr.vmem [resolvable:$true] %s27_s15 }
   0x4   :  { %s290_s18 = scalar_lea.hbm %s453_s0, 32 }
   0x5   :  { %p291_p0 = scmp.ne.s32.totalorder %s453_s0, %s290_s18  ;;  %p294_p1 = scmp.lt.u32.totalorder %s290_s18, %s453_s0 }
   0x7   :  { %p296_p2 = pnand %p294_p1, %p291_p0 }
   0x9   :  { %299 = shalt.err (!%p296_p2)
}
   0xa   :  { %s300_s23 = scalar_lea.vmem %s18_s13, 32  ;;  %p305_p4 = scmp.lt.s32.totalorder %s18_s13, %s18_s13 }
   0xb   :  { %p301_p3 = scmp.ne.s32.totalorder %s18_s13, %s300_s23  ;;  %p306_p5 = scmp.lt.s32.totalorder %s300_s23, %s300_s23 }
   0xd   :  { %p307_p6 = por %p306_p5, %p305_p4 }
   0xf   :  { %p308_p7 = pnand %p307_p6, %p301_p3 }
  0x11   :  { %311 = shalt.err (!%p308_p7)
}
  0x12   :  { %20 = dma.hbm_to_vmem [thread:$0]  %s453_s0, 32, %s18_s13, [#allocation3]  }
  0x13   :  { %s312_s28 = scalar_lea.hbm %s454_s1, 64 }
  0x14   :  { %p313_p8 = scmp.ne.s32.totalorder %s454_s1, %s312_s28  ;;  %p316_p9 = scmp.lt.u32.totalorder %s312_s28, %s454_s1 }
  0x16   :  { %p318_p10 = pnand %p316_p9, %p313_p8 }
  0x18   :  { %321 = shalt.err (!%p318_p10)
}
  0x19   :  { %s322_s6 = scalar_lea.vmem %s28_s15, 64  ;;  %p327_p12 = scmp.lt.s32.totalorder %s28_s15, %s28_s15 }
  0x1a   :  { %p323_p11 = scmp.ne.s32.totalorder %s28_s15, %s322_s6  ;;  %p328_p13 = scmp.lt.s32.totalorder %s322_s6, %s322_s6 }
  0x1c   :  { %p329_p0 = por %p328_p13, %p327_p12 }
  0x1e   :  { %p330_p1 = pnand %p329_p0, %p323_p11 }
  0x20   :  { %333 = shalt.err (!%p330_p1)
}
  0x21   :  { %30 = dma.hbm_to_vmem [thread:$0]  %s454_s1, 64, %s28_s15, [#allocation6]  }
  0x22   :  { %356 = dma.done.wait [#allocation3], 32  }
  0x23   :  { %357 = vsyncadd [#allocation3], 4294967264 }
  0x24   :  { %358 = dma.done.wait [#allocation6], 64  }
  0x25   :  { %359 = vsyncadd [#allocation6], 4294967232  ;;  %v364_v0 = vmov 0.0   ;;  %vm365_vm0 = vmmov 0   ;;  %vm45_vm1 = vcmask 1043456   ;;  %vm41_vm2 = vcmask 31744  }
  0x26   :  { %266 = vmatprep.subr.mxu0 %v364_v0  ;;  %268 = vmatprep.mubr.msk.f32.mxu0 %vm365_vm0, %v364_v0  ;;  %v40_v1 = vld [vmem:[#allocation5] sm:$0xf]  ;;  %v39_v2 = vld [vmem:[#allocation2] sm:$0x3]  ;;  %v120_v3 = vlaneseq  ;;  %v366_v31 = vmov 683565275  }
  0x27   :  { %267 = vmatpush3.msk.msra.mxu0 %vm45_vm1, %v40_v1  ;;  %v119_v6 = vld [vmem:[%s455_s2] sm:$0x3]  ;;  %v367_v33 = vmov 2475754826   ;;  %v368_v36 = vmov 2131351028  }
  0x28   :  { %269 = vmatmul.mubr.msk.f32.vlgmr.msra.gmra.mrb[0].mxu0 %vm41_vm2, %v39_v2  ;;  %v121_v4 = vshrl.u32 %v120_v3, 7  ;;  %v369_v39 = vmov 2102212464   ;;  %v370_v42 = vmov 920167782   ;;  %s372_s1 = smov [#allocation7]  }
  0x29   :  { %v371_v45 = vmov 1326507024   ;;  %s248_s2 = sshll.u32 %s372_s1, 4  ;;  %s249_s2 = int_to_ptr.vmem [resolvable:$true] %s248_s2 }
  0x2a   :  { %v122_v5 = vsub.s32 0, %v121_v4  ;;  %v127_v7 = vsub.s32 1, %v121_v4  ;;  %s334_s10 = scalar_lea.vmem %s249_s2, 32  ;;  %p339_p3 = scmp.lt.s32.totalorder %s249_s2, %s249_s2 }
  0x2b   :  { %p335_p2 = scmp.ne.s32.totalorder %s249_s2, %s334_s10  ;;  %p340_p4 = scmp.lt.s32.totalorder %s334_s10, %s334_s10 }
  0x2c   :  { %v123_v8 = vrot.slane %v119_v6, %v122_v5  ;;  %v128_v9 = vrot.slane %v119_v6, %v127_v7 }
  0x2d   :  { %p341_p5 = por %p340_p4, %p339_p3 }
  0x2f   :  { %p342_p6 = pnand %p341_p5, %p335_p2 }
  0xfb   :  { %v115_v10 = vpop.f32.mrb[0].mxu0 }
  0xfc   :  { %v124_v11 = vmul.f32 %v123_v8, %v115_v10  ;;  %v270_v12 = vpop.f32.mrb[1].mxu0 }
  0xfe   :  { %v129_v13 = vadd.f32 %v128_v9, %v124_v11 }
 0x100   :  { %v130_v14 = vmul.f32 0.15915494, %v129_v13 }
 0x102   :  { %v131_v15 = vadd.f32 0.5, %v130_v14 }
 0x104   :  { %v132_v16 = vfloor.f32 %v131_v15 }
 0x106   :  { %v133_v17 = vmul.f32 6.2831855, %v132_v16  ;;  %v135_v19 = vmul.f32 -1.7484555e-07, %v132_v16 }
 0x108   :  { %v134_v18 = vsub.f32 %v129_v13, %v133_v17 }
 0x10a   :  { %v420_v20 = vsub.f32 %v134_v18, %v135_v19 }
 0x10c   :  { %v140_v21 = vand.u32 2139095040, %v420_v20  ;;  %v137_v25 = vand.u32 2147483647, %v420_v20  ;;  %vm139_vm10 = vcmp.lt.s32.totalorder %v420_v20, 0  ;;  %vm229_vm15 = vweird.f32 %v420_v20 }
 0x10e   :  { %v141_v22 = vshrl.u32 %v140_v21, 23  ;;  %v144_v29 = vand.u32 8388607, %v137_v25  ;;  %vm138_vm11 = vcmp.le.f32.partialorder %v137_v25, 0.7853982 }
 0x110   :  { %v260_v23 = vadd.s32 4294967169, %v141_v22  ;;  %v145_v47 = vor.u32 8388608, %v144_v29 }
 0x112   :  { %v147_v24 = vadd.s32 1, %v260_v23  ;;  %v185_v61 = vshll.u32 %v145_v47, 8 }
 0x114   :  { %vm148_vm3 = vcmp.gt.s32.totalorder %v147_v24, 0 }
 0x115   :  { %v149_v26 = vsel %vm148_vm3, %v147_v24, 0 }
 0x116   :  { %v151_v27 = vand.u32 31, %v149_v26  ;;  %v150_v30 = vshrl.u32 %v149_v26, 5 }
 0x118   :  { %v152_v28 = vsub.s32 32, %v151_v27  ;;  %v154_v32 = vshll.u32 %v366_v31, %v151_v27  ;;  %v157_v34 = vshll.u32 %v367_v33, %v151_v27  ;;  %v160_v38 = vshll.u32 %v368_v36, %v151_v27 }
 0x119   :  { %v163_v41 = vshll.u32 %v369_v39, %v151_v27  ;;  %v166_v44 = vshll.u32 %v370_v42, %v151_v27  ;;  %vm169_vm4 = vcmp.lt.s32.totalorder %v150_v30, 1  ;;  %vm172_vm5 = vcmp.lt.s32.totalorder %v150_v30, 4 }
 0x11a   :  { %v155_v35 = vshrl.u32 %v367_v33, %v152_v28  ;;  %v158_v37 = vshrl.u32 %v368_v36, %v152_v28  ;;  %v161_v40 = vshrl.u32 %v369_v39, %v152_v28  ;;  %v164_v43 = vshrl.u32 %v370_v42, %v152_v28 }
 0x11b   :  { %v167_v46 = vshrl.u32 %v371_v45, %v152_v28  ;;  %v153_v56 = vshrl.u32 %v366_v31, %v152_v28  ;;  %vm171_vm6 = vcmp.lt.s32.totalorder %v150_v30, 3  ;;  %vm170_vm7 = vcmp.lt.s32.totalorder %v150_v30, 2 }
 0x11c   :  { %v156_v48 = vor.u32 %v155_v35, %v154_v32  ;;  %v159_v49 = vor.u32 %v158_v37, %v157_v34  ;;  %v162_v50 = vor.u32 %v161_v40, %v160_v38  ;;  %v165_v51 = vor.u32 %v164_v43, %v163_v41 }
 0x11d   :  { %v168_v52 = vor.u32 %v167_v46, %v166_v44 }
 0x11e   :  { %v174_v53 = vsel %vm172_vm5, %v162_v50, 2102212464  ;;  %v177_v54 = vsel %vm169_vm4, %v156_v48, %v159_v49  ;;  %v181_v55 = vsel %vm169_vm4, %v159_v49, %v162_v50  ;;  %v178_v57 = vsel %vm172_vm5, %v165_v51, 920167782 }
 0x11f   :  { %v182_v58 = vsel %vm172_vm5, %v168_v52, 1326507024  ;;  %v179_v59 = vsel %vm171_vm6, %v162_v50, %v178_v57  ;;  %v173_v62 = vsel %vm169_vm4, %v153_v56, %v156_v48  ;;  %v175_v63 = vsel %vm171_vm6, %v159_v49, %v174_v53 }
 0x120   :  { %v183_v60 = vsel %vm171_vm6, %v165_v51, %v182_v58  ;;  %v180_v0 = vsel %vm170_vm7, %v177_v54, %v179_v59  ;;  %v176_v6 = vsel %vm170_vm7, %v173_v62, %v175_v63 }
 0x121   :  { %v184_v1 = vsel %vm170_vm7, %v181_v55, %v183_v60  ;;  %v429_v4 = vmul.u32.u64.low %v185_v61, %v180_v0  ;;  %v430_v5 = vmul.u32.u64.high %v185_v61, %v180_v0, %v429_v4  ;;  %v192_v8 = vmul.u32 %v185_v61, %v176_v6 }
 0x122   :  { %v426_v2 = vmul.u32.u64.low %v185_v61, %v184_v1  ;;  %v427_v3 = vmul.u32.u64.high %v185_v61, %v184_v1, %v426_v2 }
 0x123   :  { %v195_v7 = vadd.s32 1, %v430_v5 }
 0x124   :  { %vm194_vm8 = vc.u32 %v427_v3, %v429_v4  ;;  %v193_v21 = vadd.s32 %v429_v4, %v427_v3 }
 0x125   :  { %v196_v9 = vsel %vm194_vm8, %v195_v7, %v430_v5 }
 0x126   :  { %v197_v10 = vadd.s32 %v196_v9, %v192_v8 }
 0x128   :  { %v198_v11 = vadd.s32 536870912, %v197_v10 }
 0x12a   :  { %v199_v12 = vshrl.u32 %v198_v11, 30 }
 0x12c   :  { %v200_v13 = vshll.u32 %v199_v12, 30  ;;  %v223_v34 = vsub.s32 4, %v199_v12 }
 0x12e   :  { %v201_v14 = vsub.s32 %v197_v10, %v200_v13  ;;  %v224_v37 = vsel %vm139_vm10, %v223_v34, %v199_v12 }
 0x12f   :  { %v226_v39 = vsel %vm138_vm11, 0, %v224_v37 }
 0x130   :  { %v203_v15 = vsub.s32 0, %v201_v14  ;;  %v230_v40 = vadd.s32 3, %v226_v39 }
 0x132   :  { %v261_v16 = vmin.u32 %v203_v15, %v201_v14  ;;  %v231_v41 = vand.u32 3, %v230_v40 }
 0x134   :  { %v205_v17 = vclz %v261_v16  ;;  %vm236_vm12 = vcmp.eq.s32.totalorder %v231_v41, 2  ;;  %vm233_vm13 = vcmp.eq.s32.totalorder %v231_v41, 0  ;;  %vm232_vm14 = vcmp.lt.s32.totalorder %v231_v41, 2 }
 0x136   :  { %v262_v18 = vadd.s32 4294967294, %v205_v17 }
 0x138   :  { %vm263_vm9 = vcmp.lt.s32.totalorder %v262_v18, 0 }
 0x139   :  { %v208_v19 = vsel %vm263_vm9, 0, %v262_v18 }
 0x13a   :  { %v209_v22 = vsub.s32 32, %v208_v19  ;;  %v213_v23 = vsub.s32 4294967266, %v208_v19  ;;  %v210_v24 = vshll.u32 %v201_v14, %v208_v19 }
 0x13c   :  { %v211_v26 = vshrl.u32 %v193_v21, %v209_v22  ;;  %v214_v27 = vadd.s32 127, %v213_v23 }
 0x13e   :  { %v212_v28 = vor.u32 %v211_v26, %v210_v24  ;;  %v215_v29 = vshll.u32 %v214_v27, 23 }
 0x140   :  { %v216_v30 = vor.u32 4788187, %v215_v29  ;;  %v219_v32 = vcvt.s32.f32 %v212_v28 }
 0x142   :  { %v217_v31 = vand.u32 2147483647, %v216_v30 }
 0x144   :  { %v220_v33 = vmul.f32 %v219_v32, %v217_v31 }
 0x146   :  { %v221_v35 = vxor.u32 2147483648, %v220_v33 }
 0x148   :  { %v222_v36 = vsel %vm139_vm10, %v221_v35, %v220_v33 }
 0x149   :  { %v225_v38 = vsel %vm138_vm11, %v420_v20, %v222_v36 }
 0x14a   :  { %286 = vcosq.f32 %v225_v38 }
 0x14b   :  { %288 = vsinq.f32 %v225_v38 }
 0x154   :  { %v287_v42 = vpop.eup %286 }
 0x155   :  { %v289_v43 = vpop.eup %288  ;;  %v237_v44 = vxor.u32 2147483648, %v287_v42 }
 0x156   :  { %v234_v45 = vxor.u32 2147483648, %v289_v43 }
 0x157   :  { %v238_v46 = vsel %vm236_vm12, %v237_v44, %v289_v43 }
 0x158   :  { %v235_v25 = vsel %vm233_vm13, %v287_v42, %v234_v45 }
 0x159   :  { %v239_v47 = vsel %vm232_vm14, %v235_v25, %v238_v46 }
 0x15a   :  { %v240_v48 = vsel %vm229_vm15, nan, %v239_v47 }
 0x15b   :  { %241 = vst [vmem:[#allocation7] sm:$0x3] %v240_v48 }
 0x15c   :  { %345 = shalt.err (!%p342_p6)
}
 0x15d   :  { %s346_s13 = scalar_lea.hbm %s456_s3, 32 }
 0x15e   :  { %p347_p7 = scmp.ne.s32.totalorder %s456_s3, %s346_s13  ;;  %p350_p8 = scmp.lt.u32.totalorder %s346_s13, %s456_s3 }
 0x160   :  { %p352_p9 = pnand %p350_p8, %p347_p7 }
 0x162   :  { %355 = shalt.err (!%p352_p9)
}
 0x163   :  { %251 = dma.vmem_to_hbm [thread:$0]  %s249_s2, 32, %s456_s3, [#allocation4]  }
 0x164   :  { %360 = dma.done.wait [#allocation4], 32  }
 0x165   :  { %361 = vsyncadd [#allocation4], 4294967264 }
 0x166   :  { %255 = vsyncpa [#allocation3], 1 }
 0x167   :  { %256 = vsyncpa [#allocation6], 1 }
 0x168   :  { %257 = vsyncpa [#allocation4], 1 }

</bundles_post_ra>
